<compile_context>
chip_gen: v7x
topology: tpu7x:2x2x1
jax: 0.10.0
libtpu: 0.0.40
codegen_flags: <defaults>
</compile_context>

<pallas_src>
import jax
import jax.numpy as jnp
from jax.experimental import pallas as pl
from jax.experimental.pallas import tpu as pltpu  # noqa: F401  (TPU backend)

BN_EPS = 1e-5
LANE = 128  # TPU lane width — pad feature dims to this for lane-dense stores


def _round_up(n, m):
    return ((n + m - 1) // m) * m


def _full_spec(shape):
    # Single grid point -> whole-array block; index map takes no grid args.
    return pl.BlockSpec(shape, lambda: tuple(0 for _ in shape))


# ---------------------------------------------------------------------------
# Fused kernel: whole MLP in one pallas_call, activations stay on-chip.
# ---------------------------------------------------------------------------
def make_fused_mlp_kernel(num_blocks, n_batch):
    """Kernel for: num_blocks x [Linear, ReLU, BN] followed by final Linear.

    Ref order (all feature dims pre-padded to multiples of 128, weights
    pre-transposed to (F_in, F_out)):
      x        (N, in_p)
      w_first  (in_p, hid_p)
      w_rest   (num_blocks-1, hid_p, hid_p)     [only if num_blocks > 1]
      bias_s   (num_blocks, hid_p)
      gamma_s  (num_blocks, hid_p)
      beta_s   (num_blocks, hid_p)
      w_out    (hid_p, out_p)
      b_out    (1, out_p)
      o_ref    (N, out_p)
    """
    inv_n = 1.0 / float(n_batch)
    has_rest = num_blocks > 1

    def kernel(*refs):
        it = iter(refs)
        x_ref = next(it)
        w_first_ref = next(it)
        w_rest_ref = next(it) if has_rest else None
        bias_ref = next(it)
        gamma_ref = next(it)
        beta_ref = next(it)
        w_out_ref = next(it)
        b_out_ref = next(it)
        o_ref = next(it)

        h = x_ref[...]  # (N, in_p) f32, lane-padded
        for i in range(num_blocks):
            w = w_first_ref[...] if i == 0 else w_rest_ref[i - 1]
            # Linear (MXU): x @ W (W already (F_in, F_out)), bias add + ReLU (VPU)
            h = jnp.dot(h, w, preferred_element_type=jnp.float32)
            h = jnp.maximum(h + bias_ref[i:i + 1, :], 0.0)
            # BatchNorm1d (training mode) — one-pass stats + folded affine,
            # all statistics in f32.
            sum1 = jnp.sum(h, axis=0, keepdims=True)        # (1, F)
            sum2 = jnp.sum(h * h, axis=0, keepdims=True)    # (1, F)
            mean = sum1 * inv_n
            var = sum2 * inv_n - mean * mean                 # biased variance
            scale = jax.lax.rsqrt(var + BN_EPS) * gamma_ref[i:i + 1, :]
            shift = beta_ref[i:i + 1, :] - mean * scale
            h = h * scale + shift
        # Final Linear
        out = jnp.dot(h, w_out_ref[...], preferred_element_type=jnp.float32)
        o_ref[...] = (out + b_out_ref[...]).astype(o_ref.dtype)

    return kernel


# ---------------------------------------------------------------------------
# Parameter init (mimics nn.Linear default U(-1/sqrt(fan_in), +1/sqrt(fan_in)))
# Weights in PyTorch layout (out_features, in_features).
# ---------------------------------------------------------------------------
def init_params(key, input_size, num_layers, hidden_size, output_size):
    params = []
    in_dim = input_size
    for _ in range(num_layers - 1):
        key, kw, kb = jax.random.split(key, 3)
        bound = 1.0 / jnp.sqrt(in_dim)
        w = jax.random.uniform(kw, (hidden_size, in_dim), jnp.float32, -bound, bound)
        b = jax.random.uniform(kb, (1, hidden_size), jnp.float32, -bound, bound)
        gamma = jnp.ones((1, hidden_size), jnp.float32)
        beta = jnp.zeros((1, hidden_size), jnp.float32)
        params.append(("block", w, b, gamma, beta))
        in_dim = hidden_size
    key, kw, kb = jax.random.split(key, 3)
    bound = 1.0 / jnp.sqrt(in_dim)
    w = jax.random.uniform(kw, (output_size, in_dim), jnp.float32, -bound, bound)
    b = jax.random.uniform(kb, (1, output_size), jnp.float32, -bound, bound)
    params.append(("linear", w, b))
    return params


# ---------------------------------------------------------------------------
# One-time prep: transpose, lane-pad and stack all parameters (hoisted out of
# the per-call forward path).
# ---------------------------------------------------------------------------
def prepare_params(params):
    blocks = [p for p in params if p[0] == "block"]
    final = [p for p in params if p[0] == "linear"][0]
    num_blocks = len(blocks)

    hidden, in_dim = blocks[0][1].shape          # first block: (hidden, in_dim)
    out_dim = final[1].shape[0]

    in_p = _round_up(in_dim, LANE)
    hid_p = _round_up(hidden, LANE)
    out_p = _round_up(out_dim, LANE)

    arrays = []
    # First block weight: (in_p, hid_p), pre-transposed, zero-padded.
    arrays.append(jnp.pad(blocks[0][1].T,
                          ((0, in_p - in_dim), (0, hid_p - hidden))))
    # Remaining hidden-to-hidden weights stacked: (num_blocks-1, hid_p, hid_p).
    if num_blocks > 1:
        arrays.append(jnp.stack([
            jnp.pad(blk[1].T, ((0, hid_p - hidden), (0, hid_p - hidden)))
            for blk in blocks[1:]
        ]))
    # Bias / gamma / beta stacked to (num_blocks, hid_p).  ZERO padding of
    # gamma/beta is load-bearing for padded-lane correctness (see header).
    arrays.append(jnp.stack([jnp.pad(blk[2][0], (0, hid_p - hidden)) for blk in blocks]))
    arrays.append(jnp.stack([jnp.pad(blk[3][0], (0, hid_p - hidden)) for blk in blocks]))
    arrays.append(jnp.stack([jnp.pad(blk[4][0], (0, hid_p - hidden)) for blk in blocks]))
    # Final linear.
    arrays.append(jnp.pad(final[1].T, ((0, hid_p - hidden), (0, out_p - out_dim))))
    arrays.append(jnp.pad(final[2], ((0, 0), (0, out_p - out_dim))))

    # TODO(synk): for large hidden_size, cast the weight slabs to bf16 here
    # (keep preferred_element_type=f32 and BN stats in f32) to halve DMA bytes
    # and hit the full-rate bf16 MXU path on v6e/v7x.
    return {
        "arrays": tuple(arrays),
        "num_blocks": num_blocks,
        "in_dim": in_dim,
        "in_p": in_p,
        "out_dim": out_dim,
        "out_p": out_p,
    }


# ---------------------------------------------------------------------------
# Jitted forward: pad x, one fused pallas_call, slice the lane-padded result.
# ---------------------------------------------------------------------------
def build_forward(prep):
    arrays = prep["arrays"]
    num_blocks = prep["num_blocks"]
    in_dim, in_p = prep["in_dim"], prep["in_p"]
    out_dim, out_p = prep["out_dim"], prep["out_p"]

    @jax.jit
    def _fwd(x, *arrs):
        n = x.shape[0]
        x_p = jnp.pad(x, ((0, 0), (0, in_p - in_dim)))
        inputs = (x_p,) + arrs
        kernel = make_fused_mlp_kernel(num_blocks, n)
        # TODO(synk): if batch or hidden_size grow (esp. on v7x's 64 MiB VMEM),
        # tile the batch axis over a grid with dimension_semantics=("parallel",)
        # and switch BN to accumulated two-pass stats, and/or raise
        # pltpu.CompilerParams(vmem_limit_bytes=...) on v6e/v5e.
        out_padded = pl.pallas_call(
            kernel,
            out_shape=jax.ShapeDtypeStruct((n, out_p), jnp.float32),
            grid=(),
            in_specs=[_full_spec(a.shape) for a in inputs],
            out_specs=_full_spec((n, out_p)),
        )(*inputs)
        return out_padded[:, :out_dim]

    def forward(x):
        return _fwd(x, *arrays)

    return forward


# ---------------------------------------------------------------------------
# Pure-JAX reference (for in-script correctness validation)
# ---------------------------------------------------------------------------
def forward_ref(params, x):
    for p in params:
        if p[0] == "block":
            _, w, b, gamma, beta = p
            h = x @ w.T + b
            h = jnp.maximum(h, 0.0)
            mean = jnp.mean(h, axis=0, keepdims=True)
            var = jnp.mean((h - mean) ** 2, axis=0, keepdims=True)
            x = (h - mean) * jax.lax.rsqrt(var + BN_EPS) * gamma + beta
        else:
            _, w, b = p
            x = x @ w.T + b
    return x


# ---------------------------------------------------------------------------
if __name__ == "__main__":
    # Hyperparameters implied by the module's __init__
    input_size = 16
    num_layers = 3      # -> 2 fused [Linear, ReLU, BN] blocks + final Linear
    hidden_size = 32
    output_size = 4
    batch_size = 8

    key = jax.random.PRNGKey(0)
    key, kx = jax.random.split(key)
    x = jax.random.normal(kx, (batch_size, input_size), jnp.float32)

    params = init_params(key, input_size, num_layers, hidden_size, output_size)

    prep = prepare_params(params)          # one-time layout prep (hoisted)
    forward = build_forward(prep)          # jitted forward closure

    out = jax.block_until_ready(forward(x))
    ref = jax.block_until_ready(forward_ref(params, x))

    assert out.shape == (batch_size, output_size), out.shape
    assert jnp.all(jnp.isfinite(out))
    assert jnp.allclose(out, ref, atol=1e-4, rtol=1e-4), float(
        jnp.max(jnp.abs(out - ref))
    )
    print("KERNEL_OK")
</pallas_src>

<mosaic_0001>
module attributes {stable_mosaic.version = 11 : i64} {
  func.func @kernel(%arg0: memref<8x128xf32, #tpu.memory_space<vmem>>, %arg1: memref<128x128xf32, #tpu.memory_space<vmem>>, %arg2: memref<1x128x128xf32, #tpu.memory_space<vmem>>, %arg3: memref<2x128xf32, #tpu.memory_space<vmem>>, %arg4: memref<2x128xf32, #tpu.memory_space<vmem>>, %arg5: memref<2x128xf32, #tpu.memory_space<vmem>>, %arg6: memref<128x128xf32, #tpu.memory_space<vmem>>, %arg7: memref<1x128xf32, #tpu.memory_space<vmem>>, %arg8: memref<8x128xf32, #tpu.memory_space<vmem>>) attributes {dimension_semantics = [], scalar_prefetch = 0 : i64, scratch_operands = 0 : i64, tpu.core_type = #tpu.core_type<tc>} {
    %c0 = arith.constant 0 : index
    %c0_0 = arith.constant 0 : index
    %0 = vector.load %arg0[%c0, %c0_0] : memref<8x128xf32, #tpu.memory_space<vmem>>, vector<8x128xf32>
    %c0_1 = arith.constant 0 : index
    %c0_2 = arith.constant 0 : index
    %1 = vector.load %arg1[%c0_1, %c0_2] : memref<128x128xf32, #tpu.memory_space<vmem>>, vector<128x128xf32>
    %cst = arith.constant dense<0.000000e+00> : vector<8x128xf32>
    %2 = tpu.matmul %0, %1, %cst {dimension_numbers = #tpu.dot_dimension_numbers<[1], [0], [0], [1], [0, 0, 1, 1], [], []>} : vector<8x128xf32>, vector<128x128xf32>, vector<8x128xf32> -> vector<8x128xf32>
    %c0_3 = arith.constant 0 : index
    %c0_4 = arith.constant 0 : index
    %3 = vector.load %arg3[%c0_3, %c0_4] : memref<2x128xf32, #tpu.memory_space<vmem>>, vector<1x128xf32>
    %4 = vector.broadcast %3 : vector<1x128xf32> to vector<8x128xf32>
    %5 = arith.addf %2, %4 : vector<8x128xf32>
    %cst_5 = arith.constant 0.000000e+00 : f32
    %6 = vector.broadcast %cst_5 : f32 to vector<8x128xf32>
    %7 = arith.maximumf %5, %6 : vector<8x128xf32>
    %cst_6 = arith.constant dense<0.000000e+00> : vector<128xf32>
    %8 = vector.multi_reduction <add>, %7, %cst_6 [0] : vector<8x128xf32> to vector<128xf32>
    %9 = vector.shape_cast %8 : vector<128xf32> to vector<1x128xf32>
    %10 = arith.mulf %7, %7 : vector<8x128xf32>
    %cst_7 = arith.constant dense<0.000000e+00> : vector<128xf32>
    %11 = vector.multi_reduction <add>, %10, %cst_7 [0] : vector<8x128xf32> to vector<128xf32>
    %12 = vector.shape_cast %11 : vector<128xf32> to vector<1x128xf32>
    %cst_8 = arith.constant 1.250000e-01 : f32
    %13 = vector.broadcast %cst_8 : f32 to vector<1x128xf32>
    %14 = arith.mulf %9, %13 : vector<1x128xf32>
    %cst_9 = arith.constant 1.250000e-01 : f32
    %15 = vector.broadcast %cst_9 : f32 to vector<1x128xf32>
    %16 = arith.mulf %12, %15 : vector<1x128xf32>
    %17 = arith.mulf %14, %14 : vector<1x128xf32>
    %18 = arith.subf %16, %17 : vector<1x128xf32>
    %cst_10 = arith.constant 9.99999974E-6 : f32
    %19 = vector.broadcast %cst_10 : f32 to vector<1x128xf32>
    %20 = arith.addf %18, %19 : vector<1x128xf32>
    %21 = math.rsqrt %20 : vector<1x128xf32>
    %c0_11 = arith.constant 0 : index
    %c0_12 = arith.constant 0 : index
    %22 = vector.load %arg4[%c0_11, %c0_12] : memref<2x128xf32, #tpu.memory_space<vmem>>, vector<1x128xf32>
    %23 = arith.mulf %21, %22 : vector<1x128xf32>
    %c0_13 = arith.constant 0 : index
    %c0_14 = arith.constant 0 : index
    %24 = vector.load %arg5[%c0_13, %c0_14] : memref<2x128xf32, #tpu.memory_space<vmem>>, vector<1x128xf32>
    %25 = arith.mulf %14, %23 : vector<1x128xf32>
    %26 = arith.subf %24, %25 : vector<1x128xf32>
    %27 = vector.broadcast %23 : vector<1x128xf32> to vector<8x128xf32>
    %28 = arith.mulf %7, %27 : vector<8x128xf32>
    %29 = vector.broadcast %26 : vector<1x128xf32> to vector<8x128xf32>
    %30 = arith.addf %28, %29 : vector<8x128xf32>
    %c0_15 = arith.constant 0 : index
    %c0_16 = arith.constant 0 : index
    %c0_17 = arith.constant 0 : index
    %31 = vector.load %arg2[%c0_15, %c0_16, %c0_17] : memref<1x128x128xf32, #tpu.memory_space<vmem>>, vector<1x128x128xf32>
    %32 = vector.shape_cast %31 : vector<1x128x128xf32> to vector<128x128xf32>
    %cst_18 = arith.constant dense<0.000000e+00> : vector<8x128xf32>
    %33 = tpu.matmul %30, %32, %cst_18 {dimension_numbers = #tpu.dot_dimension_numbers<[1], [0], [0], [1], [0, 0, 1, 1], [], []>} : vector<8x128xf32>, vector<128x128xf32>, vector<8x128xf32> -> vector<8x128xf32>
    %c1 = arith.constant 1 : index
    %c0_19 = arith.constant 0 : index
    %34 = vector.load %arg3[%c1, %c0_19] : memref<2x128xf32, #tpu.memory_space<vmem>>, vector<1x128xf32>
    %35 = vector.broadcast %34 : vector<1x128xf32> to vector<8x128xf32>
    %36 = arith.addf %33, %35 : vector<8x128xf32>
    %cst_20 = arith.constant 0.000000e+00 : f32
    %37 = vector.broadcast %cst_20 : f32 to vector<8x128xf32>
    %38 = arith.maximumf %36, %37 : vector<8x128xf32>
    %cst_21 = arith.constant dense<0.000000e+00> : vector<128xf32>
    %39 = vector.multi_reduction <add>, %38, %cst_21 [0] : vector<8x128xf32> to vector<128xf32>
    %40 = vector.shape_cast %39 : vector<128xf32> to vector<1x128xf32>
    %41 = arith.mulf %38, %38 : vector<8x128xf32>
    %cst_22 = arith.constant dense<0.000000e+00> : vector<128xf32>
    %42 = vector.multi_reduction <add>, %41, %cst_22 [0] : vector<8x128xf32> to vector<128xf32>
    %43 = vector.shape_cast %42 : vector<128xf32> to vector<1x128xf32>
    %cst_23 = arith.constant 1.250000e-01 : f32
    %44 = vector.broadcast %cst_23 : f32 to vector<1x128xf32>
    %45 = arith.mulf %40, %44 : vector<1x128xf32>
    %cst_24 = arith.constant 1.250000e-01 : f32
    %46 = vector.broadcast %cst_24 : f32 to vector<1x128xf32>
    %47 = arith.mulf %43, %46 : vector<1x128xf32>
    %48 = arith.mulf %45, %45 : vector<1x128xf32>
    %49 = arith.subf %47, %48 : vector<1x128xf32>
    %cst_25 = arith.constant 9.99999974E-6 : f32
    %50 = vector.broadcast %cst_25 : f32 to vector<1x128xf32>
    %51 = arith.addf %49, %50 : vector<1x128xf32>
    %52 = math.rsqrt %51 : vector<1x128xf32>
    %c1_26 = arith.constant 1 : index
    %c0_27 = arith.constant 0 : index
    %53 = vector.load %arg4[%c1_26, %c0_27] : memref<2x128xf32, #tpu.memory_space<vmem>>, vector<1x128xf32>
    %54 = arith.mulf %52, %53 : vector<1x128xf32>
    %c1_28 = arith.constant 1 : index
    %c0_29 = arith.constant 0 : index
    %55 = vector.load %arg5[%c1_28, %c0_29] : memref<2x128xf32, #tpu.memory_space<vmem>>, vector<1x128xf32>
    %56 = arith.mulf %45, %54 : vector<1x128xf32>
    %57 = arith.subf %55, %56 : vector<1x128xf32>
    %58 = vector.broadcast %54 : vector<1x128xf32> to vector<8x128xf32>
    %59 = arith.mulf %38, %58 : vector<8x128xf32>
    %60 = vector.broadcast %57 : vector<1x128xf32> to vector<8x128xf32>
    %61 = arith.addf %59, %60 : vector<8x128xf32>
    %c0_30 = arith.constant 0 : index
    %c0_31 = arith.constant 0 : index
    %62 = vector.load %arg6[%c0_30, %c0_31] : memref<128x128xf32, #tpu.memory_space<vmem>>, vector<128x128xf32>
    %cst_32 = arith.constant dense<0.000000e+00> : vector<8x128xf32>
    %63 = tpu.matmul %61, %62, %cst_32 {dimension_numbers = #tpu.dot_dimension_numbers<[1], [0], [0], [1], [0, 0, 1, 1], [], []>} : vector<8x128xf32>, vector<128x128xf32>, vector<8x128xf32> -> vector<8x128xf32>
    %c0_33 = arith.constant 0 : index
    %c0_34 = arith.constant 0 : index
    %64 = vector.load %arg7[%c0_33, %c0_34] : memref<1x128xf32, #tpu.memory_space<vmem>>, vector<1x128xf32>
    %65 = vector.broadcast %64 : vector<1x128xf32> to vector<8x128xf32>
    %66 = arith.addf %63, %65 : vector<8x128xf32>
    %c0_35 = arith.constant 0 : index
    %c0_36 = arith.constant 0 : index
    %67 = vector.load %arg8[%c0_35, %c0_36] : memref<8x128xf32, #tpu.memory_space<vmem>>, vector<8x128xf32>
    tpu.vector_store %arg8[%c0_35, %c0_36], %66 {strides = array<i32>} : memref<8x128xf32, #tpu.memory_space<vmem>>, vector<8x128xf32>,
    return
  }
}

</mosaic_0001>

<bundles_post_ra>
// kernel: _fwd.1
= control target key start
LH: loop header
LB: loop body
LE: loop exit
PB: predicated region body
PF: predicated region fallthrough
CT: control target
= control target key end

     0   :  { %13 = vsyncpa [#allocation3], 0  ;;  %s901_s0 = inlined_call_operand.vmem [shape: f32[8,128], index: 0, kind: input, shape index: {}]   ;;  %s902_s1 = inlined_call_operand.hbm [shape: f32[128,128], index: 1, kind: input, shape index: {}]   ;;  %s903_s2 = inlined_call_operand.hbm [shape: f32[1,128,128], index: 2, kind: input, shape index: {}]   ;;  %s904_s3 = inlined_call_operand.vmem [shape: f32[2,128], index: 3, kind: input, shape index: {}]   ;;  %s905_s4 = inlined_call_operand.vmem [shape: f32[2,128], index: 4, kind: input, shape index: {}]   ;;  %s906_s5 = inlined_call_operand.vmem [shape: f32[2,128], index: 5, kind: input, shape index: {}]   ;;  %s907_s6 = inlined_call_operand.hbm [shape: f32[128,128], index: 6, kind: input, shape index: {}]   ;;  %s908_s7 = inlined_call_operand.vmem [shape: f32[1,128], index: 7, kind: input, shape index: {}]   ;;  %s909_s8 = inlined_call_operand.vmem [shape: f32[8,128], index: 8, kind: output, shape index: {}]  }
   0x1   :  { %14 = vsyncpa [#allocation5], 0  ;;  %s736_s27 = smov [#allocation4]   ;;  %s737_s29 = smov [#allocation2]  }
   0x2   :  { %s34_s28 = sshll.u32 %s736_s27, 4  ;;  %s22_s30 = sshll.u32 %s737_s29, 4  ;;  %s35_s28 = int_to_ptr.vmem [resolvable:$true] %s34_s28  ;;  %s789_s30 = int_to_ptr.vmem [resolvable:$true] %s22_s30 }
   0x3   :  { %s666_s11 = scalar_lea.hbm %s903_s2, 2048 }
   0x4   :  { %p667_p0 = scmp.ne.s32.totalorder %s903_s2, %s666_s11  ;;  %p670_p1 = scmp.lt.u32.totalorder %s666_s11, %s903_s2 }
   0x6   :  { %p672_p2 = pnand %p670_p1, %p667_p0 }
   0x8   :  { %675 = shalt.err (!%p672_p2)
}
   0x9   :  { %s676_s16 = scalar_lea.vmem %s35_s28, 2048  ;;  %p681_p4 = scmp.lt.s32.totalorder %s35_s28, %s35_s28 }
   0xa   :  { %p677_p3 = scmp.ne.s32.totalorder %s35_s28, %s676_s16  ;;  %p682_p5 = scmp.lt.s32.totalorder %s676_s16, %s676_s16 }
   0xc   :  { %p683_p6 = por %p682_p5, %p681_p4 }
   0xe   :  { %p684_p7 = pnand %p683_p6, %p677_p3 }
  0x10   :  { %687 = shalt.err (!%p684_p7)
}
  0x11   :  { %s738_s17 = smov 128   ;;  %s739_s18 = smov 8  }
  0x12   :  { %40 = dma.hbm_to_vmem [thread:$0]  %s903_s2, 2048, %s35_s28, [#allocation5], %s738_s17, %s738_s17, %s739_s18  }
  0x13   :  { %s688_s23 = scalar_lea.hbm %s902_s1, 2048 }
  0x14   :  { %p689_p8 = scmp.ne.s32.totalorder %s902_s1, %s688_s23  ;;  %p692_p9 = scmp.lt.u32.totalorder %s688_s23, %s902_s1 }
  0x16   :  { %p694_p10 = pnand %p692_p9, %p689_p8 }
  0x18   :  { %697 = shalt.err (!%p694_p10)
}
  0x19   :  { %s698_s29 = scalar_lea.vmem %s789_s30, 2048  ;;  %p703_p12 = scmp.lt.s32.totalorder %s789_s30, %s789_s30 }
  0x1a   :  { %p699_p11 = scmp.ne.s32.totalorder %s789_s30, %s698_s29  ;;  %p704_p13 = scmp.lt.s32.totalorder %s698_s29, %s698_s29 }
  0x1c   :  { %p705_p0 = por %p704_p13, %p703_p12 }
  0x1e   :  { %p706_p1 = pnand %p705_p0, %p699_p11 }
  0x20   :  { %709 = shalt.err (!%p706_p1)
}
  0x21   :  { %28 = dma.hbm_to_vmem [thread:$0]  %s902_s1, 2048, %s789_s30, [#allocation3], %s738_s17, %s738_s17, %s739_s18  }
  0x22   :  { %s740_s9 = smov [#allocation6]   ;;  %s710_s13 = scalar_lea.hbm %s907_s6, 2048 }
  0x23   :  { %s52_s10 = sshll.u32 %s740_s9, 4  ;;  %p711_p2 = scmp.ne.s32.totalorder %s907_s6, %s710_s13  ;;  %s53_s10 = int_to_ptr.vmem [resolvable:$true] %s52_s10 }
  0x24   :  { %p714_p3 = scmp.lt.u32.totalorder %s710_s13, %s907_s6 }
  0x26   :  { %p716_p4 = pnand %p714_p3, %p711_p2 }
  0x28   :  { %719 = shalt.err (!%p716_p4)
}
  0x29   :  { %s720_s20 = scalar_lea.vmem %s53_s10, 2048  ;;  %p725_p6 = scmp.lt.s32.totalorder %s53_s10, %s53_s10 }
  0x2a   :  { %p721_p5 = scmp.ne.s32.totalorder %s53_s10, %s720_s20  ;;  %p726_p7 = scmp.lt.s32.totalorder %s720_s20, %s720_s20 }
  0x2c   :  { %p727_p8 = por %p726_p7, %p725_p6 }
  0x2e   :  { %p728_p9 = pnand %p727_p8, %p721_p5 }
  0x30   :  { %731 = shalt.err (!%p728_p9)
}
  0x31   :  { %58 = dma.hbm_to_vmem [thread:$0]  %s907_s6, 2048, %s53_s10, [#allocation5], %s738_s17, %s738_s17, %s739_s18  }
  0x32   :  { %732 = dma.done.wait [#allocation3], 2048  }
  0x33   :  { %733 = vsyncadd [#allocation3], 4294965248 }
  0x34   :  { %734 = dma.done.wait [#allocation5], 4096  }
  0x35   :  { %735 = vsyncadd [#allocation5], 4294963200  ;;  %v741_v0 = vmov 0.0|0.0   ;;  %vm742_vm0 = vmmov 0   ;;  %v743_v1 = vmov 0.0   ;;  %v71_v2 = vld [vmem:[#allocation2] sm:$0xff] }
  0x36   :  { %582 = vmatprep.subr.bf16.mxu0 %v741_v0  ;;  %509 = vmatprep.mubr.msk.f32.mxu0 %vm742_vm0, %v743_v1  ;;  %v72_v3 = vld [vmem:[#allocation2 + $0x8] sm:$0xff]  ;;  %v73_v4 = vld [vmem:[#allocation2 + $0x10] sm:$0xff]  ;;  %v74_v6 = vld [vmem:[#allocation2 + $0x18] sm:$0xff] }
  0x37   :  { %606 = vmatprep.subr.bf16.mxu1 %v741_v0  ;;  %544 = vmatprep.mubr.msk.f32.mxu1 %vm742_vm0, %v743_v1  ;;  %v583_v5 = vpack.c.bf16 %v72_v3, %v71_v2  ;;  %v586_v7 = vpack.c.bf16 %v74_v6, %v73_v4  ;;  %v75_v8 = vld [vmem:[#allocation2 + $0x20] sm:$0xff]  ;;  %v76_v9 = vld [vmem:[#allocation2 + $0x28] sm:$0xff]  ;;  %v77_v11 = vld [vmem:[#allocation2 + $0x30] sm:$0xff] }
  0x38   :  { %v589_v10 = vpack.c.bf16 %v76_v9, %v75_v8  ;;  %v78_v12 = vld [vmem:[#allocation2 + $0x38] sm:$0xff]  ;;  %v79_v14 = vld [vmem:[#allocation2 + $0x40] sm:$0xff]  ;;  %v80_v15 = vld [vmem:[#allocation2 + $0x48] sm:$0xff] }
  0x39   :  { %584 = vmatpush3.bf16.msra.mxu0 %v583_v5  ;;  %v592_v13 = vpack.c.bf16 %v78_v12, %v77_v11  ;;  %v595_v16 = vpack.c.bf16 %v80_v15, %v79_v14  ;;  %v81_v17 = vld [vmem:[#allocation2 + $0x50] sm:$0xff]  ;;  %v82_v18 = vld [vmem:[#allocation2 + $0x58] sm:$0xff]  ;;  %v83_v20 = vld [vmem:[#allocation2 + $0x60] sm:$0xff]  ;;  %v187_v11 = vlaneseq }
  0x3a   :  { %585 = vmatprep.subr.bf16.mxu0 %v741_v0  ;;  %v598_v19 = vpack.c.bf16 %v82_v18, %v81_v17  ;;  %v84_v21 = vld [vmem:[#allocation2 + $0x68] sm:$0xff]  ;;  %v85_v23 = vld [vmem:[#allocation2 + $0x70] sm:$0xff]  ;;  %v86_v24 = vld [vmem:[#allocation2 + $0x78] sm:$0xff] }
  0x3b   :  { %v601_v22 = vpack.c.bf16 %v84_v21, %v83_v20  ;;  %v604_v25 = vpack.c.bf16 %v86_v24, %v85_v23  ;;  %v70_v26 = vld [vmem:[%s901_s0] sm:$0xff]  ;;  %v198_v28 = vld [vmem:[#allocation4 + $0x8] sm:$0xff]  ;;  %v199_v30 = vld [vmem:[#allocation4 + $0x10] sm:$0xff]  ;;  %v188_v12 = vshrl.u32 %v187_v11, 7 }
  0x3c   :  { %v197_v27 = vld [vmem:[#allocation4] sm:$0xff]  ;;  %v200_v31 = vld [vmem:[#allocation4 + $0x18] sm:$0xff]  ;;  %v202_v34 = vld [vmem:[#allocation4 + $0x28] sm:$0xff] }
  0x3d   :  { %587 = vmatpush3.bf16.msra.mxu0 %v586_v7  ;;  %v607_v29 = vpack.c.bf16 %v198_v28, %v197_v27  ;;  %v610_v32 = vpack.c.bf16 %v200_v31, %v199_v30  ;;  %v201_v33 = vld [vmem:[#allocation4 + $0x20] sm:$0xff]  ;;  %v203_v36 = vld [vmem:[#allocation4 + $0x30] sm:$0xff]  ;;  %v204_v37 = vld [vmem:[#allocation4 + $0x38] sm:$0xff]  ;;  %v870_v14 = vsub.s32 0, %v188_v12 }
  0x3e   :  { %588 = vmatprep.subr.bf16.mxu0 %v741_v0  ;;  %v613_v35 = vpack.c.bf16 %v202_v34, %v201_v33  ;;  %v616_v38 = vpack.c.bf16 %v204_v37, %v203_v36  ;;  %v205_v39 = vld [vmem:[#allocation4 + $0x40] sm:$0xff]  ;;  %v206_v40 = vld [vmem:[#allocation4 + $0x48] sm:$0xff]  ;;  %v207_v42 = vld [vmem:[#allocation4 + $0x50] sm:$0xff] }
  0x3f   :  { %608 = vmatpush3.bf16.msra.mxu1 %v607_v29  ;;  %v619_v41 = vpack.c.bf16 %v206_v40, %v205_v39  ;;  %v208_v43 = vld [vmem:[#allocation4 + $0x58] sm:$0xff]  ;;  %v209_v45 = vld [vmem:[#allocation4 + $0x60] sm:$0xff]  ;;  %v210_v46 = vld [vmem:[#allocation4 + $0x68] sm:$0xff] }
  0x40   :  { %609 = vmatprep.subr.bf16.mxu1 %v741_v0  ;;  %v622_v44 = vpack.c.bf16 %v208_v43, %v207_v42  ;;  %v625_v47 = vpack.c.bf16 %v210_v46, %v209_v45  ;;  %v211_v48 = vld [vmem:[#allocation4 + $0x70] sm:$0xff]  ;;  %v212_v49 = vld [vmem:[#allocation4 + $0x78] sm:$0xff]  ;;  %v423_v51 = vld [vmem:[%s904_s3] ss:$0 sm:$0xff] }
  0x41   :  { %590 = vmatpush3.bf16.msra.mxu0 %v589_v10  ;;  %v628_v50 = vpack.c.bf16 %v212_v49, %v211_v48  ;;  %v184_v17 = vld [vmem:[%s906_s5] sm:$0x1]  ;;  %v325_v27 = vld [vmem:[#allocation6 + $0x10] sm:$0xff]  ;;  %v326_v28 = vld [vmem:[#allocation6 + $0x18] sm:$0xff] }
  0x42   :  { %591 = vmatprep.subr.bf16.mxu0 %v741_v0  ;;  %v323_v24 = vld [vmem:[#allocation6] sm:$0xff]  ;;  %v634_v29 = vpack.c.bf16 %v326_v28, %v325_v27  ;;  %v328_v31 = vld [vmem:[#allocation6 + $0x28] sm:$0xff]  ;;  %v329_v33 = vld [vmem:[#allocation6 + $0x30] sm:$0xff] }
  0x43   :  { %611 = vmatpush3.bf16.msra.mxu1 %v610_v32  ;;  %v327_v30 = vld [vmem:[#allocation6 + $0x20] sm:$0xff]  ;;  %v330_v34 = vld [vmem:[#allocation6 + $0x38] sm:$0xff]  ;;  %v332_v37 = vld [vmem:[#allocation6 + $0x48] sm:$0xff] }
  0x44   :  { %612 = vmatprep.subr.bf16.mxu1 %v741_v0  ;;  %v637_v32 = vpack.c.bf16 %v328_v31, %v327_v30  ;;  %v331_v36 = vld [vmem:[#allocation6 + $0x40] sm:$0xff]  ;;  %v333_v39 = vld [vmem:[#allocation6 + $0x50] sm:$0xff]  ;;  %v334_v40 = vld [vmem:[#allocation6 + $0x58] sm:$0xff] }
  0x45   :  { %593 = vmatpush3.bf16.msra.mxu0 %v592_v13  ;;  %v182_v13 = vld [vmem:[%s905_s4] sm:$0x1]  ;;  %v336_v43 = vld [vmem:[#allocation6 + $0x68] sm:$0xff]  ;;  %v337_v45 = vld [vmem:[#allocation6 + $0x70] sm:$0xff] }
  0x46   :  { %594 = vmatprep.subr.bf16.mxu0 %v741_v0  ;;  %v335_v42 = vld [vmem:[#allocation6 + $0x60] sm:$0xff]  ;;  %v338_v46 = vld [vmem:[#allocation6 + $0x78] sm:$0xff] }
  0x47   :  { %614 = vmatpush3.bf16.msra.mxu1 %v613_v35  ;;  %v640_v35 = vpack.c.bf16 %v330_v34, %v329_v33  ;;  %v424_v48 = vld [vmem:[%s904_s3 + $0x1] ss:$0 sm:$0xff] }
  0x48   :  { %615 = vmatprep.subr.bf16.mxu1 %v741_v0 }
  0x49   :  { %596 = vmatpush3.bf16.msra.mxu0 %v595_v16 }
  0x4a   :  { %597 = vmatprep.subr.bf16.mxu0 %v741_v0 }
  0x4b   :  { %617 = vmatpush3.bf16.msra.mxu1 %v616_v38  ;;  %v643_v38 = vpack.c.bf16 %v332_v37, %v331_v36 }
  0x4c   :  { %618 = vmatprep.subr.bf16.mxu1 %v741_v0 }
  0x4d   :  { %599 = vmatpush3.bf16.msra.mxu0 %v598_v19 }
  0x4e   :  { %600 = vmatprep.subr.bf16.mxu0 %v741_v0 }
  0x4f   :  { %620 = vmatpush3.bf16.msra.mxu1 %v619_v41  ;;  %v646_v41 = vpack.c.bf16 %v334_v40, %v333_v39 }
  0x50   :  { %621 = vmatprep.subr.bf16.mxu1 %v741_v0 }
  0x51   :  { %602 = vmatpush3.bf16.msra.mxu0 %v601_v22 }
  0x52   :  { %603 = vmatprep.subr.bf16.mxu0 %v741_v0 }
  0x53   :  { %623 = vmatpush3.bf16.msra.mxu1 %v622_v44  ;;  %v649_v44 = vpack.c.bf16 %v336_v43, %v335_v42 }
  0x54   :  { %624 = vmatprep.subr.bf16.mxu1 %v741_v0 }
  0x55   :  { %605 = vmatpush3.bf16.msra.mxu0 %v604_v25  ;;  %v324_v25 = vld [vmem:[#allocation6 + $0x8] sm:$0xff] }
  0x56   :  { %630 = vmatprep.subr.bf16.mxu0 %v741_v0 }
  0x57   :  { %626 = vmatpush3.bf16.msra.mxu1 %v625_v47  ;;  %v652_v47 = vpack.c.bf16 %v338_v46, %v337_v45 }
  0x58   :  { %510 = vmatmul.mubr.f32.vlgmr.msra.gmra.mrb[0].mxu0 %v70_v26  ;;  %627 = vmatprep.subr.bf16.mxu1 %v741_v0  ;;  %v631_v26 = vpack.c.bf16 %v324_v25, %v323_v24 }
  0x59   :  { %579 = vmatprep.mubr.msk.f32.mxu0 %vm742_vm0, %v743_v1 }
  0x5a   :  { %632 = vmatpush3.bf16.msra.mxu0 %v631_v26 }
  0x5b   :  { %629 = vmatpush3.bf16.msra.mxu1 %v628_v50  ;;  %633 = vmatprep.subr.bf16.mxu0 %v741_v0 }
  0x5e   :  { %635 = vmatpush3.bf16.msra.mxu0 %v634_v29 }
  0x5f   :  { %636 = vmatprep.subr.bf16.mxu0 %v741_v0 }
  0x62   :  { %638 = vmatpush3.bf16.msra.mxu0 %v637_v32 }
  0x63   :  { %639 = vmatprep.subr.bf16.mxu0 %v741_v0 }
  0x66   :  { %641 = vmatpush3.bf16.msra.mxu0 %v640_v35 }
  0x67   :  { %642 = vmatprep.subr.bf16.mxu0 %v741_v0 }
  0x6a   :  { %644 = vmatpush3.bf16.msra.mxu0 %v643_v38 }
  0x6b   :  { %645 = vmatprep.subr.bf16.mxu0 %v741_v0 }
  0x6e   :  { %647 = vmatpush3.bf16.msra.mxu0 %v646_v41 }
  0x6f   :  { %648 = vmatprep.subr.bf16.mxu0 %v741_v0 }
  0x72   :  { %650 = vmatpush3.bf16.msra.mxu0 %v649_v44 }
  0x73   :  { %651 = vmatprep.subr.bf16.mxu0 %v741_v0 }
  0x76   :  { %653 = vmatpush3.bf16.msra.mxu0 %v652_v47 }
 0x12b   :  { %v158_v52 = vpop.f32.mrb[0].mxu0 }
 0x12c   :  { %v159_v53 = vadd.f32 %v423_v51, %v158_v52  ;;  %v511_v54 = vpop.f32.mrb[1].mxu0 }
 0x12e   :  { %v162_v55 = vmax.f32 %v159_v53, 0.0 }
 0x130   :  { %v163_v56 = vrot.slane %v162_v55, 4  ;;  %v169_v57 = vmul.f32 %v162_v55, %v162_v55 }
 0x132   :  { %v164_v58 = vadd.f32 %v163_v56, %v162_v55  ;;  %v170_v59 = vrot.slane %v169_v57, 4 }
 0x134   :  { %v165_v60 = vrot.slane %v164_v58, 2  ;;  %v171_v61 = vadd.f32 %v170_v59, %v169_v57 }
 0x136   :  { %v166_v62 = vadd.f32 %v165_v60, %v164_v58  ;;  %v172_v63 = vrot.slane %v171_v61, 2 }
 0x138   :  { %v167_v1 = vrot.slane %v166_v62, 1  ;;  %v173_v2 = vadd.f32 %v172_v63, %v171_v61 }
 0x13a   :  { %v174_v3 = vrot.slane %v173_v2, 1  ;;  %v168_v4 = vadd.f32 %v167_v1, %v166_v62 }
 0x13c   :  { %v175_v5 = vadd.f32 %v174_v3, %v173_v2  ;;  %v176_v6 = vmul.f32 0.125, %v168_v4 }
 0x13e   :  { %v177_v7 = vmul.f32 0.125, %v175_v5  ;;  %v178_v8 = vmul.f32 %v176_v6, %v176_v6 }
 0x140   :  { %v179_v9 = vsub.f32 %v177_v7, %v178_v8  ;;  %v308_v7 = vld [vmem:[%s905_s4 + $0x1] sm:$0x1] }
 0x142   :  { %v180_v10 = vadd.f32 1e-05, %v179_v9 }
 0x144   :  { %662 = vrsqrt.f32 %v180_v10  ;;  %v310_v10 = vld [vmem:[%s906_s5 + $0x1] sm:$0x1] }
 0x14e   :  { %v663_v15 = vpop.eup %662 }
 0x14f   :  { %v183_v16 = vmul.f32 %v663_v15, %v182_v13 }
 0x151   :  { %v185_v18 = vmul.f32 %v183_v16, %v176_v6  ;;  %v190_v19 = vrot.slane %v183_v16, %v870_v14 }
 0x153   :  { %v186_v20 = vsub.f32 %v184_v17, %v185_v18  ;;  %v191_v21 = vmul.f32 %v190_v19, %v162_v55  ;;  %v425_v18 = vld [vmem:[%s908_s7] ss:$0 sm:$0xff] }
 0x155   :  { %v195_v22 = vrot.slane %v186_v20, %v870_v14 }
 0x157   :  { %v196_v23 = vadd.f32 %v195_v22, %v191_v21 }
 0x159   :  { %545 = vmatmul.mubr.f32.vlgmr.msra.gmra.mrb[0].mxu1 %v196_v23 }
 0x22c   :  { %v284_v49 = vpop.f32.mrb[0].mxu1 }
 0x22d   :  { %v285_v50 = vadd.f32 %v424_v48, %v284_v49  ;;  %v546_v51 = vpop.f32.mrb[1].mxu1 }
 0x22f   :  { %v288_v52 = vmax.f32 %v285_v50, 0.0 }
 0x231   :  { %v289_v53 = vrot.slane %v288_v52, 4  ;;  %v295_v54 = vmul.f32 %v288_v52, %v288_v52 }
 0x233   :  { %v290_v55 = vadd.f32 %v289_v53, %v288_v52  ;;  %v296_v56 = vrot.slane %v295_v54, 4 }
 0x235   :  { %v291_v57 = vrot.slane %v290_v55, 2  ;;  %v297_v58 = vadd.f32 %v296_v56, %v295_v54 }
 0x237   :  { %v292_v59 = vadd.f32 %v291_v57, %v290_v55  ;;  %v298_v0 = vrot.slane %v297_v58, 2 }
 0x239   :  { %v293_v60 = vrot.slane %v292_v59, 1  ;;  %v299_v61 = vadd.f32 %v298_v0, %v297_v58 }
 0x23b   :  { %v294_v62 = vadd.f32 %v293_v60, %v292_v59  ;;  %v300_v63 = vrot.slane %v299_v61, 1 }
 0x23d   :  { %v301_v1 = vadd.f32 %v300_v63, %v299_v61  ;;  %v302_v2 = vmul.f32 0.125, %v294_v62 }
 0x23f   :  { %v303_v3 = vmul.f32 0.125, %v301_v1  ;;  %v304_v4 = vmul.f32 %v302_v2, %v302_v2 }
 0x241   :  { %v305_v5 = vsub.f32 %v303_v3, %v304_v4 }
 0x243   :  { %v306_v6 = vadd.f32 1e-05, %v305_v5 }
 0x245   :  { %664 = vrsqrt.f32 %v306_v6 }
 0x24f   :  { %v665_v8 = vpop.eup %664 }
 0x250   :  { %v309_v9 = vmul.f32 %v665_v8, %v308_v7 }
 0x252   :  { %v316_v11 = vrot.slane %v309_v9, %v870_v14  ;;  %v311_v12 = vmul.f32 %v309_v9, %v302_v2 }
 0x254   :  { %v312_v13 = vsub.f32 %v310_v10, %v311_v12  ;;  %v317_v15 = vmul.f32 %v316_v11, %v288_v52 }
 0x256   :  { %v321_v16 = vrot.slane %v312_v13, %v870_v14 }
 0x258   :  { %v322_v17 = vadd.f32 %v321_v16, %v317_v15 }
 0x25a   :  { %580 = vmatmul.mubr.f32.vlgmr.msra.gmra.mrb[2].mxu0 %v322_v17 }
 0x32d   :  { %v412_v19 = vpop.f32.mrb[2].mxu0 }
 0x32e   :  { %v413_v20 = vadd.f32 %v425_v18, %v412_v19  ;;  %v581_v21 = vpop.f32.mrb[3].mxu0 }
 0x330   :  { %416 = vst [vmem:[%s909_s8] sm:$0xff] %v413_v20 }
 0x331   :  { %421 = vsyncpa [#allocation3], 1 }
 0x332   :  { %422 = vsyncpa [#allocation5], 1 }

</bundles_post_ra>
